<compile_context>
chip_gen: v6e
topology: v6e:2x2x1
jax: 0.10.0
libtpu: 0.0.40
codegen_flags: <defaults>
</compile_context>

<pallas_src>
import functools

import jax
import jax.numpy as jnp
from jax import lax
from jax.experimental import pallas as pl
from jax.experimental.pallas import tpu as pltpu

LANE = 128            # lane width (last dim)
MAX_TILE_M = 2048     # 2048 rows * 128 lanes * 4 B = 1 MiB per f32 input block
SUB_CHUNK_M = 256     # rows per in-kernel elementwise sub-chunk (bounds VMEM temps)
ACC_ROWS = 64         # widened accumulator rows (8 vregs of independent adders)
# Below this element count, use plain jnp (fixed pallas_call overhead dominates).
# Kept low here so the small demo still exercises the kernel; production would
# typically raise it to ~16-32K elements.
PALLAS_MIN_ELEMENTS = 2048


def _bce_with_logits_mean_ref(x, t):
    """Plain-JAX reference / small-input fallback (same math as the kernel)."""
    x = jnp.clip(x.astype(jnp.float32), -60.0, 60.0)
    t = t.astype(jnp.float32)
    loss = jnp.maximum(x, 0.0) - x * t + jnp.log1p(jnp.exp(-jnp.abs(x)))
    return jnp.mean(loss)


def _clip_bce_kernel(x_ref, t_ref, o_ref, *, steps, steps_per_core, tile_m,
                     chunk_m, acc_rows, tail_valid, need_tail_mask):
    """Accumulates (acc_rows, 128) partial sums of BCE-with-logits on clamped logits."""
    p = pl.program_id(0)                 # core-parallel axis
    k = pl.program_id(1)                 # sequential reduction axis
    g = p * steps_per_core + k           # global row-tile index (== steps -> dummy step)

    @pl.when(k == 0)
    def _init():
        o_ref[...] = jnp.zeros_like(o_ref)

    num_chunks = tile_m // chunk_m
    groups_per_chunk = chunk_m // acc_rows

    def chunk_partial(ci, masked):
        start = pl.multiple_of(ci * chunk_m, chunk_m)
        x = x_ref[pl.ds(start, chunk_m), :].astype(jnp.float32)
        t = t_ref[pl.ds(start, chunk_m), :].astype(jnp.float32)
        x = jnp.clip(x, -60.0, 60.0)
        # Numerically stable BCEWithLogits: max(x,0) - x*t + log1p(exp(-|x|))
        loss = jnp.maximum(x, 0.0) - x * t + jnp.log1p(jnp.exp(-jnp.abs(x)))
        if masked:
            # Tile-local element index (< tile_m*128 = 262,144): int32-safe for
            # any global input size; tail_valid is a static per-tile threshold.
            row = lax.broadcasted_iota(jnp.int32, (chunk_m, LANE), 0)
            col = lax.broadcasted_iota(jnp.int32, (chunk_m, LANE), 1)
            idx = (ci * chunk_m + row) * LANE + col
            loss = jnp.where(idx < tail_valid, loss, 0.0)
        if groups_per_chunk > 1:
            return loss.reshape(groups_per_chunk, acc_rows, LANE).sum(axis=0)
        return loss

    def tile_partial(masked):
        if num_chunks == 1:
            return chunk_partial(0, masked)
        return lax.fori_loop(
            0, num_chunks,
            lambda ci, acc: acc + chunk_partial(ci, masked),
            jnp.zeros((acc_rows, LANE), jnp.float32),
            unroll=True)

    if need_tail_mask:
        if steps > 1:
            @pl.when(g < steps - 1)            # hot path: interior tiles, no mask
            def _interior():
                o_ref[...] += tile_partial(False)[None]

        @pl.when(g == steps - 1)               # tail tile: lane pad / ragged rows
        def _tail():
            o_ref[...] += tile_partial(True)[None]
    else:
        @pl.when(g < steps)                    # skip only the dummy step (if any)
        def _all():
            o_ref[...] += tile_partial(False)[None]
    # g == steps (possible only on the 2nd core when the tile count is odd) is a
    # dummy step: index_map clamps its block and no accumulation happens.


@functools.partial(jax.jit, static_argnames=("max_tile_rows", "min_pallas_elements"))
def clip_loss(inputs, targets, *, max_tile_rows=MAX_TILE_M,
              min_pallas_elements=PALLAS_MIN_ELEMENTS):
    """Equivalent of ClipLoss().forward(inputs, targets) -> scalar mean loss."""
    x = inputs.reshape(-1)
    t = targets.reshape(-1)
    n = x.shape[0]

    # Tiny inputs: pallas_call launch/DMA overhead dominates; use plain jnp.
    if n < max(min_pallas_elements, 8 * LANE):
        return _bce_with_logits_mean_ref(x, t).astype(inputs.dtype)

    # --- static tiling decisions (shapes are static under jit) ---
    rows = -(-n // LANE)                      # ceil(n / 128)
    lane_pad = rows * LANE - n                # < 128
    if lane_pad:
        # Only the <128-element lane remainder is padded; when n % 128 == 0 the
        # reshape below is metadata-only (no HBM copy).
        x = jnp.pad(x, (0, lane_pad))
        t = jnp.pad(t, (0, lane_pad))
    x2 = x.reshape(rows, LANE)
    t2 = t.reshape(rows, LANE)

    tile_m = min((max_tile_rows // 8) * 8, (rows // 8) * 8)   # multiple of 8, <= rows
    tile_m = max(tile_m, 8)
    for acc_rows in (ACC_ROWS, 32, 16, 8):
        if tile_m % acc_rows == 0:
            break
    chunk_m = SUB_CHUNK_M if tile_m % SUB_CHUNK_M == 0 else tile_m

    steps = -(-rows // tile_m)                # last tile may be ragged
    num_cores = 2 if steps >= 2 else 1        # megacore split on v7x; loop elsewhere
    steps_per_core = -(-steps // num_cores)

    tail_valid = n - (steps - 1) * tile_m * LANE        # valid elems in tail tile
    need_tail_mask = tail_valid != tile_m * LANE

    kernel = functools.partial(
        _clip_bce_kernel,
        steps=steps, steps_per_core=steps_per_core, tile_m=tile_m,
        chunk_m=chunk_m, acc_rows=acc_rows,
        tail_valid=tail_valid, need_tail_mask=need_tail_mask,
    )

    if num_cores * steps_per_core == steps:
        in_map = lambda p, k: (p * steps_per_core + k, 0)
    else:
        # One dummy step exists on the last core (odd tile count): clamp its block
        # index in range; its accumulation is skipped in-kernel.
        last = steps - 1
        in_map = lambda p, k: (jnp.minimum(p * steps_per_core + k, last), 0)

    partials = pl.pallas_call(
        kernel,
        out_shape=jax.ShapeDtypeStruct((num_cores, acc_rows, LANE), jnp.float32),
        grid_spec=pltpu.PrefetchScalarGridSpec(
            num_scalar_prefetch=0,
            grid=(num_cores, steps_per_core),
            in_specs=[
                pl.BlockSpec((tile_m, LANE), in_map),
                pl.BlockSpec((tile_m, LANE), in_map),
            ],
            out_specs=pl.BlockSpec((1, acc_rows, LANE), lambda p, k: (p, 0, 0)),
        ),
        compiler_params=pltpu.CompilerParams(
            # TODO(synk): on v7x, confirm via xprof that the leading axis shards
            # across both TensorCores; if not, switch it to pltpu.CORE_PARALLEL.
            dimension_semantics=("parallel", "arbitrary"),
            vmem_limit_bytes=32 * 1024 * 1024,
        ),
    )(x2, t2)

    loss_sum = jnp.sum(partials)
    # Mean over the true (unpadded) element count; match torch's output dtype.
    return (loss_sum / jnp.float32(n)).astype(inputs.dtype)


if __name__ == "__main__":
    key = jax.random.PRNGKey(0)
    k_x, k_t, k_x2, k_t2 = jax.random.split(key, 4)

    # --- primary small demo: (2, 4, 16, 16), n = 2048 (single tile, no padding) ---
    # Scale logits so the clamp(-60, 60) path is actually exercised.
    inputs = jax.random.normal(k_x, (2, 4, 16, 16), dtype=jnp.float32) * 40.0
    targets = jax.random.bernoulli(k_t, 0.5, (2, 4, 16, 16)).astype(jnp.float32)

    out = clip_loss(inputs, targets)
    out = jax.block_until_ready(out)
    ref = _bce_with_logits_mean_ref(inputs, targets)
    assert jnp.allclose(out, ref, rtol=1e-5, atol=1e-5), (out, ref)

    # --- secondary check: non-128-aligned n -> lane pad + ragged tail tile,
    #     2-core split, in-kernel tail mask; also an odd-tile-count (dummy step)
    #     configuration via a small max_tile_rows override. ---
    inputs2 = jax.random.normal(k_x2, (3, 5, 41, 17), dtype=jnp.float32) * 40.0
    targets2 = jax.random.bernoulli(k_t2, 0.3, (3, 5, 41, 17)).astype(jnp.float32)
    ref2 = _bce_with_logits_mean_ref(inputs2, targets2)

    out2a = jax.block_until_ready(clip_loss(inputs2, targets2))
    assert jnp.allclose(out2a, ref2, rtol=1e-5, atol=1e-5), (out2a, ref2)

    out2b = jax.block_until_ready(clip_loss(inputs2, targets2, max_tile_rows=32))
    assert jnp.allclose(out2b, ref2, rtol=1e-5, atol=1e-5), (out2b, ref2)

    print("KERNEL_OK")
</pallas_src>

<mosaic_0001>
module attributes {stable_mosaic.version = 11 : i64} {
  func.func @_clip_bce_kernel(%arg0: i32, %arg1: i32, %arg2: memref<16x128xf32, #tpu.memory_space<vmem>>, %arg3: memref<16x128xf32, #tpu.memory_space<vmem>>, %arg4: memref<1x16x128xf32, #tpu.memory_space<vmem>>) attributes {dimension_semantics = [#tpu.dimension_semantics<parallel>, #tpu.dimension_semantics<arbitrary>], iteration_bounds = array<i64: 1, 1>, scalar_prefetch = 0 : i64, scratch_operands = 0 : i64, tpu.core_type = #tpu.core_type<tc>, window_params = [{transform_indices = @transform_0, window_bounds = array<i64: 16, 128>}, {transform_indices = @transform_1, window_bounds = array<i64: 16, 128>}, {transform_indices = @transform_2, window_bounds = array<i64: 1, 16, 128>}]} {
    %c1_i32 = arith.constant 1 : i32
    %0 = arith.muli %arg0, %c1_i32 : i32
    %1 = arith.addi %0, %arg1 : i32
    %c0_i32 = arith.constant 0 : i32
    %2 = arith.cmpi eq, %arg1, %c0_i32 : i32
    %3 = arith.extui %2 : i1 to i32
    %c0_i32_0 = arith.constant 0 : i32
    %4 = arith.cmpi ne, %3, %c0_i32_0 : i32
    scf.if %4 {
      %cst = arith.constant 0.000000e+00 : f32
      %8 = vector.broadcast %cst : f32 to vector<1x16x128xf32>
      %c0 = arith.constant 0 : index
      %c0_3 = arith.constant 0 : index
      %c0_4 = arith.constant 0 : index
      %9 = vector.load %arg4[%c0, %c0_3, %c0_4] : memref<1x16x128xf32, #tpu.memory_space<vmem>>, vector<1x16x128xf32>
      tpu.vector_store %arg4[%c0, %c0_3, %c0_4], %8 {strides = array<i32>} : memref<1x16x128xf32, #tpu.memory_space<vmem>>, vector<1x16x128xf32>,
    } else {
    }
    %c1_i32_1 = arith.constant 1 : i32
    %5 = arith.cmpi slt, %1, %c1_i32_1 : i32
    %6 = arith.extui %5 : i1 to i32
    %c0_i32_2 = arith.constant 0 : i32
    %7 = arith.cmpi ne, %6, %c0_i32_2 : i32
    scf.if %7 {
      %c0 = arith.constant 0 : index
      %c0_3 = arith.constant 0 : index
      %c0_4 = arith.constant 0 : index
      %8 = vector.load %arg4[%c0, %c0_3, %c0_4] : memref<1x16x128xf32, #tpu.memory_space<vmem>>, vector<1x16x128xf32>
      %c0_i32_5 = arith.constant 0 : i32
      %9 = tpu.assume_multiple %c0_i32_5, 16 : i32
      %10 = arith.index_cast %9 : i32 to index
      %c0_6 = arith.constant 0 : index
      %11 = vector.load %arg2[%10, %c0_6] : memref<16x128xf32, #tpu.memory_space<vmem>>, vector<16x128xf32>
      %12 = arith.index_cast %9 : i32 to index
      %c0_7 = arith.constant 0 : index
      %13 = vector.load %arg3[%12, %c0_7] : memref<16x128xf32, #tpu.memory_space<vmem>>, vector<16x128xf32>
      %cst = arith.constant -6.000000e+01 : f32
      %cst_8 = arith.constant 6.000000e+01 : f32
      %14 = vector.broadcast %cst : f32 to vector<16x128xf32>
      %15 = arith.maximumf %14, %11 : vector<16x128xf32>
      %16 = vector.broadcast %cst_8 : f32 to vector<16x128xf32>
      %17 = arith.minimumf %16, %15 : vector<16x128xf32>
      %cst_9 = arith.constant 0.000000e+00 : f32
      %18 = vector.broadcast %cst_9 : f32 to vector<16x128xf32>
      %19 = arith.maximumf %17, %18 : vector<16x128xf32>
      %20 = arith.mulf %17, %13 : vector<16x128xf32>
      %21 = arith.subf %19, %20 : vector<16x128xf32>
      %22 = math.absf %17 : vector<16x128xf32>
      %cst_10 = arith.constant 0.000000e+00 : f32
      %23 = vector.broadcast %cst_10 : f32 to vector<16x128xf32>
      %24 = arith.subf %23, %22 : vector<16x128xf32>
      %25 = math.exp %24 : vector<16x128xf32>
      %26 = math.log1p %25 : vector<16x128xf32>
      %27 = arith.addf %21, %26 : vector<16x128xf32>
      %28 = vector.shape_cast %27 : vector<16x128xf32> to vector<1x16x128xf32>
      %29 = arith.addf %8, %28 : vector<1x16x128xf32>
      %c0_11 = arith.constant 0 : index
      %c0_12 = arith.constant 0 : index
      %c0_13 = arith.constant 0 : index
      %30 = vector.load %arg4[%c0_11, %c0_12, %c0_13] : memref<1x16x128xf32, #tpu.memory_space<vmem>>, vector<1x16x128xf32>
      tpu.vector_store %arg4[%c0_11, %c0_12, %c0_13], %29 {strides = array<i32>} : memref<1x16x128xf32, #tpu.memory_space<vmem>>, vector<1x16x128xf32>,
    } else {
    }
    return
  }
  func.func @transform_0(%arg0: i32, %arg1: i32) -> (i32, i32) {
    %c1_i32 = arith.constant 1 : i32
    %0 = arith.muli %arg0, %c1_i32 : i32
    %1 = arith.addi %0, %arg1 : i32
    %c0_i32 = arith.constant 0 : i32
    %c0_i32_0 = arith.constant 0 : i32
    return %1, %c0_i32 : i32, i32
  }
  func.func @transform_1(%arg0: i32, %arg1: i32) -> (i32, i32) {
    %c1_i32 = arith.constant 1 : i32
    %0 = arith.muli %arg0, %c1_i32 : i32
    %1 = arith.addi %0, %arg1 : i32
    %c0_i32 = arith.constant 0 : i32
    %c0_i32_0 = arith.constant 0 : i32
    return %1, %c0_i32 : i32, i32
  }
  func.func @transform_2(%arg0: i32, %arg1: i32) -> (i32, i32, i32) {
    %c0_i32 = arith.constant 0 : i32
    %c0_i32_0 = arith.constant 0 : i32
    %c0_i32_1 = arith.constant 0 : i32
    return %arg0, %c0_i32, %c0_i32_0 : i32, i32, i32
  }
}

</mosaic_0001>

<bundles_post_ra>
// kernel: clip_loss.1
= control target key start
LH: loop header
LB: loop body
LE: loop exit
PB: predicated region body
PF: predicated region fallthrough
CT: control target
= control target key end

     0   :  { %s174_s0 = inlined_call_operand.vmem [shape: f32[16,128], index: 0, kind: input, shape index: {}]   ;;  %s175_s1 = inlined_call_operand.vmem [shape: f32[16,128], index: 1, kind: input, shape index: {}]   ;;  %s176_s2 = inlined_call_operand.vmem [shape: f32[1,16,128], index: 2, kind: output, shape index: {}]  }
   0x1   :  { %v68_v0 = vld [vmem:[%s174_s0] sm:$0xff]  ;;  %v69_v1 = vld [vmem:[%s174_s0 + $0x8] sm:$0xff] }
   0x2   :  { %v130_v2 = vclamps-f32 %v68_v0, 60.0  ;;  %v131_v3 = vclamps-f32 %v69_v1, 60.0  ;;  %v70_v16 = vld [vmem:[%s175_s1] sm:$0xff]  ;;  %v71_v17 = vld [vmem:[%s175_s1 + $0x8] sm:$0xff] }
   0x4   :  { %v82_v4 = vand.u32 2147483647, %v130_v2  ;;  %v83_v5 = vand.u32 2147483647, %v131_v3  ;;  %v76_v19 = vmax.f32 %v130_v2, 0.0  ;;  %v78_v20 = vmul.f32 %v130_v2, %v70_v16 }
   0x5   :  { %v77_v23 = vmax.f32 %v131_v3, 0.0  ;;  %v79_v24 = vmul.f32 %v131_v3, %v71_v17 }
   0x6   :  { %v84_v6 = vsub.f32 0.0, %v82_v4  ;;  %v85_v7 = vsub.f32 0.0, %v83_v5  ;;  %v80_v28 = vsub.f32 %v76_v19, %v78_v20 }
   0x7   :  { %v81_v32 = vsub.f32 %v77_v23, %v79_v24 }
   0x8   :  { %v86_v8 = vmul.f32 1.442695, %v84_v6  ;;  %v88_v9 = vmul.f32 1.442695, %v85_v7 }
   0xa   :  { %133 = vpow2.f32 %v86_v8 }
   0xb   :  { %135 = vpow2.f32 %v88_v9 }
  0x17   :  { %v134_v10 = vpop.eup %133 }
  0x18   :  { %v136_v11 = vpop.eup %135  ;;  %v90_v12 = vadd.f32 1.0, %v134_v10  ;;  %v93_v14 = vmul.f32 -0.5, %v134_v10  ;;  %v96_v21 = vand.u32 2147483647, %v134_v10 }
  0x19   :  { %v99_v13 = vadd.f32 1.0, %v136_v11  ;;  %v102_v15 = vmul.f32 -0.5, %v136_v11  ;;  %v105_v25 = vand.u32 2147483647, %v136_v11 }
  0x1a   :  { %137 = vlog2.f32 %v90_v12  ;;  %v94_v18 = vadd.f32 1.0, %v93_v14  ;;  %vm97_vm0 = vcmp.lt.f32.partialorder %v96_v21, 0.0004427343 }
  0x1b   :  { %139 = vlog2.f32 %v99_v13  ;;  %v103_v22 = vadd.f32 1.0, %v102_v15  ;;  %vm106_vm1 = vcmp.lt.f32.partialorder %v105_v25, 0.0004427343 }
  0x1c   :  { %v95_v26 = vmul.f32 %v134_v10, %v94_v18 }
  0x1d   :  { %v104_v29 = vmul.f32 %v136_v11, %v103_v22 }
  0x27   :  { %v138_v27 = vpop.eup %137 }
  0x28   :  { %v140_v30 = vpop.eup %139  ;;  %v92_v31 = vmul.f32 0.6931472, %v138_v27 }
  0x29   :  { %v101_v33 = vmul.f32 0.6931472, %v140_v30 }
  0x2a   :  { %v98_v34 = vsel %vm97_vm0, %v95_v26, %v92_v31 }
  0x2b   :  { %v108_v35 = vadd.f32 %v98_v34, %v80_v28  ;;  %v107_v36 = vsel %vm106_vm1, %v104_v29, %v101_v33 }
  0x2c   :  { %v109_v37 = vadd.f32 %v107_v36, %v81_v32 }
  0x2d   :  { %112 = vst [vmem:[%s176_s2] sm:$0xff] %v108_v35 }
  0x2e   :  { %113 = vst [vmem:[%s176_s2 + $0x8] sm:$0xff] %v109_v37 }

</bundles_post_ra>
